<compile_context>
chip_gen: v6e
topology: v6e:2x2x1
jax: 0.10.0
libtpu: 0.0.40
codegen_flags: <defaults>
</compile_context>

<pallas_src>
import functools
import math

import jax
import jax.numpy as jnp
from jax import lax
from jax.experimental import pallas as pl
from jax.experimental.pallas import tpu as pltpu


# ---------------------------------------------------------------------------
# Fused ResBlock kernel: one grid step = `B` images, full height, full width
# ---------------------------------------------------------------------------
def resblock_kernel(x_ref, w1_ref, b1_ref, w2_ref, b2_ref, *rest, H, has_sc):
    if has_sc:
        ws_ref, bs_ref, out_ref, xpad_ref, h1pad_ref = rest
    else:
        out_ref, xpad_ref, h1pad_ref = rest

    B, _, wc_in = x_ref.shape          # (B, H, W*Cin_pad)
    wc_out = out_ref.shape[2]          # W*Cout

    # Biases loaded once per grid step (kept in f32).
    b1 = b1_ref[...]
    b2 = b2_ref[...]

    # ---- refresh the padded-input scratch: interior rows + two zero halo rows ----
    xpad_ref[:, 1:H + 1, :] = x_ref[...]
    zrow_in = jnp.zeros((B, 1, wc_in), xpad_ref.dtype)
    xpad_ref[:, 0:1, :] = zrow_in
    xpad_ref[:, H + 1:H + 2, :] = zrow_in

    def band_matmul(pad_ref, w_ref, wc):
        # 3 banded matmuls (one per conv kernel row); rows of all B images are
        # stacked along M so each matmul is (B*H, wc) @ (wc, wc_out), f32 accum.
        acc = jnp.dot(pad_ref[:, 0:H, :].reshape(B * H, wc), w_ref[0],
                      preferred_element_type=jnp.float32)
        for ky in (1, 2):
            acc += jnp.dot(pad_ref[:, ky:ky + H, :].reshape(B * H, wc), w_ref[ky],
                           preferred_element_type=jnp.float32)
        return acc                                            # (B*H, wc_out) f32

    # ---- stage 1: conv3x3 (BN scale folded into w1) + bias + ReLU ----
    h1 = jnp.maximum(band_matmul(xpad_ref, w1_ref, wc_in) + b1, 0.0)

    # ---- stage 2: conv3x3 (BN scale folded into w2) + bias; h1 stays in VMEM ----
    h1pad_ref[:, 1:H + 1, :] = h1.reshape(B, H, wc_out).astype(h1pad_ref.dtype)
    zrow_out = jnp.zeros((B, 1, wc_out), h1pad_ref.dtype)
    h1pad_ref[:, 0:1, :] = zrow_out
    h1pad_ref[:, H + 1:H + 2, :] = zrow_out
    left = band_matmul(h1pad_ref, w2_ref, wc_out) + b2

    # ---- shortcut: 1x1 conv + BN as one block-diagonal matmul, or identity ----
    if has_sc:
        sc = jnp.dot(x_ref[...].reshape(B * H, wc_in), ws_ref[...],
                     preferred_element_type=jnp.float32) + bs_ref[...]
    else:
        sc = x_ref[...].reshape(B * H, wc_in).astype(jnp.float32)

    out = jnp.maximum(left + sc, 0.0)
    out_ref[...] = out.reshape(B, H, wc_out).astype(out_ref.dtype)


# ---------------------------------------------------------------------------
# One-time weight re-packing (pure JAX, outside the kernel)
# ---------------------------------------------------------------------------
def conv3x3_to_band(w, W):
    """(3, 3, Cin, Cout) HWIO weight -> (3, W*Cin, W*Cout) banded matrices.

    band[ky][a*Cin + c, b*Cout + co] = w[ky, a-b+1, c, co] if |a-b| <= 1 else 0, so
        out_row_y = sum_ky  xpad_row_{y+ky} @ band[ky]
    implements the 3x3 conv (padding=1) over the flattened (W*C) lane axis; the
    width-direction zero padding is folded into the band structure."""
    _, _, cin, cout = w.shape
    idx = jnp.arange(W)
    ind = ((idx[None, :, None] - idx[None, None, :])
           == (jnp.arange(3)[:, None, None] - 1)).astype(w.dtype)   # (3, W, W)
    t = jnp.einsum('kab,ykcd->yacbd', ind, w)                       # (3, W, Cin, W, Cout)
    return t.reshape(3, W * cin, W * cout)


def conv1x1_to_blockdiag(ws, W):
    """(Cin, Cout) 1x1 conv weight -> (W*Cin, W*Cout) block-diagonal matrix."""
    cin, cout = ws.shape
    t = jnp.einsum('ab,cd->acbd', jnp.eye(W, dtype=ws.dtype), ws)   # (W, Cin, W, Cout)
    return t.reshape(W * cin, W * cout)


def _pad_channels_for_lanes(cin, W, max_factor=4):
    """Smallest cin' >= cin such that W*cin' is a multiple of 128 (lane-dense),
    unless that would over-inflate the channel count."""
    g = 128 // math.gcd(W, 128)
    cin_p = ((cin + g - 1) // g) * g
    return cin_p if cin_p <= max_factor * max(cin, 1) else cin


# ---------------------------------------------------------------------------
# Wrapper: full ResBlock forward (NHWC in / NHWC out), stride=1 only
# ---------------------------------------------------------------------------
def res_block_forward(x_nhwc, params, *, compute_dtype=jnp.float32,
                      out_dtype=None, images_per_step=1):
    N, H, W, Cin = x_nhwc.shape
    Cout = params["w1"].shape[-1]
    has_sc = "ws" in params
    out_dtype = compute_dtype if out_dtype is None else out_dtype
    assert N % images_per_step == 0, "images_per_step must divide the batch"
    n_steps = N // images_per_step

    # Lane-dense input: zero-pad Cin so W*Cin_pad is a multiple of 128.  Only when
    # the shortcut is a conv (identity shortcut needs the x layout == out layout).
    cin_p = _pad_channels_for_lanes(Cin, W) if has_sc else Cin
    w1 = params["w1"]
    if cin_p != Cin:
        x_nhwc = jnp.pad(x_nhwc, ((0, 0), (0, 0), (0, 0), (0, cin_p - Cin)))
        w1 = jnp.pad(w1, ((0, 0), (0, 0), (0, cin_p - Cin), (0, 0)))

    # Fold eval-mode BN scales into the conv weights; re-pack as banded / block-diag.
    w1b = conv3x3_to_band((w1 * params["scale1"][0]).astype(compute_dtype), W)
    w2b = conv3x3_to_band((params["w2"] * params["scale2"][0]).astype(compute_dtype), W)
    b1 = jnp.tile(params["bias1"].astype(jnp.float32), (1, W))      # (1, W*Cout)
    b2 = jnp.tile(params["bias2"].astype(jnp.float32), (1, W))

    x_flat = x_nhwc.reshape(N, H, W * cin_p).astype(compute_dtype)  # lane dim = W*Cin_pad

    args = [x_flat, w1b, b1, w2b, b2]
    in_specs = [
        pl.BlockSpec((images_per_step, H, W * cin_p), lambda i: (i, 0, 0)),
        pl.BlockSpec((3, W * cin_p, W * Cout), lambda i: (0, 0, 0)),
        pl.BlockSpec((1, W * Cout), lambda i: (0, 0)),
        pl.BlockSpec((3, W * Cout, W * Cout), lambda i: (0, 0, 0)),
        pl.BlockSpec((1, W * Cout), lambda i: (0, 0)),
    ]
    if has_sc:
        ws = params["ws"]
        if cin_p != Cin:
            ws = jnp.pad(ws, ((0, cin_p - Cin), (0, 0)))
        wsb = conv1x1_to_blockdiag((ws * params["scale_s"][0]).astype(compute_dtype), W)
        bs = jnp.tile(params["bias_s"].astype(jnp.float32), (1, W))
        args += [wsb, bs]
        in_specs += [
            pl.BlockSpec((W * cin_p, W * Cout), lambda i: (0, 0)),
            pl.BlockSpec((1, W * Cout), lambda i: (0, 0)),
        ]

    out_flat = pl.pallas_call(
        functools.partial(resblock_kernel, H=H, has_sc=has_sc),
        out_shape=jax.ShapeDtypeStruct((N, H, W * Cout), out_dtype),
        grid=(n_steps,),                       # batch grid: pipelined, megacore-able
        in_specs=in_specs,
        out_specs=pl.BlockSpec((images_per_step, H, W * Cout), lambda i: (i, 0, 0)),
        scratch_shapes=[
            pltpu.VMEM((images_per_step, H + 2, W * cin_p), compute_dtype),  # padded x
            pltpu.VMEM((images_per_step, H + 2, W * Cout), compute_dtype),   # padded h1
        ],
        compiler_params=pltpu.CompilerParams(
            dimension_semantics=("parallel",),       # v7x: split steps across 2 TCs
            vmem_limit_bytes=32 * 1024 * 1024),      # well under v7x's 64 MiB physical
    )(*args)
    return out_flat.reshape(N, H, W, Cout)


# ---------------------------------------------------------------------------
# Pure-JAX reference (lax.conv) for correctness checking
# ---------------------------------------------------------------------------
def res_block_reference(x_nhwc, params):
    dn = ("NHWC", "HWIO", "NHWC")
    h = lax.conv_general_dilated(x_nhwc, params["w1"], (1, 1),
                                 ((1, 1), (1, 1)), dimension_numbers=dn)
    h = h * params["scale1"][0] + params["bias1"][0]
    h = jnp.maximum(h, 0.0)
    h2 = lax.conv_general_dilated(h, params["w2"], (1, 1),
                                  ((1, 1), (1, 1)), dimension_numbers=dn)
    h2 = h2 * params["scale2"][0] + params["bias2"][0]
    if "ws" in params:
        Cin, Cout = params["ws"].shape
        sc = lax.conv_general_dilated(
            x_nhwc, params["ws"].reshape(1, 1, Cin, Cout), (1, 1),
            "VALID", dimension_numbers=dn)
        sc = sc * params["scale_s"][0] + params["bias_s"][0]
    else:
        sc = x_nhwc
    return jnp.maximum(h2 + sc, 0.0)


# ---------------------------------------------------------------------------
# Deterministic parameter construction (eval-mode BN folded into scale/bias)
# ---------------------------------------------------------------------------
def make_params(key, cin, cout, eps=1e-5):
    ks = jax.random.split(key, 12)

    def bn_fold(kg, kb, km, kv, c):
        gamma = 1.0 + 0.1 * jax.random.normal(kg, (c,), jnp.float32)
        beta = 0.1 * jax.random.normal(kb, (c,), jnp.float32)
        mean = 0.05 * jax.random.normal(km, (c,), jnp.float32)
        var = 1.0 + 0.1 * jnp.abs(jax.random.normal(kv, (c,), jnp.float32))
        scale = gamma / jnp.sqrt(var + eps)
        bias = beta - mean * scale
        return scale.reshape(1, c), bias.reshape(1, c)

    p = {}
    p["w1"] = 0.1 * jax.random.normal(ks[0], (3, 3, cin, cout), jnp.float32)
    p["scale1"], p["bias1"] = bn_fold(ks[1], ks[2], ks[3], ks[4], cout)
    p["w2"] = 0.1 * jax.random.normal(ks[5], (3, 3, cout, cout), jnp.float32)
    p["scale2"], p["bias2"] = bn_fold(ks[6], ks[7], ks[8], ks[9], cout)
    if cin != cout:  # shortcut = conv1x1 + BN (stride fixed at 1 here)
        p["ws"] = 0.1 * jax.random.normal(ks[10], (cin, cout), jnp.float32)
        sk = jax.random.split(ks[11], 4)
        p["scale_s"], p["bias_s"] = bn_fold(sk[0], sk[1], sk[2], sk[3], cout)
    return p


if __name__ == "__main__":
    N, Cin, H, W = 2, 4, 16, 16
    Cout = 8  # inchannel != outchannel -> exercises the conv1x1+BN shortcut

    key = jax.random.PRNGKey(0)
    kx, kp = jax.random.split(key)
    x_nchw = jax.random.normal(kx, (N, Cin, H, W), jnp.float32)  # PyTorch NCHW input
    x_nhwc = jnp.transpose(x_nchw, (0, 2, 3, 1))                 # kernel layout: NHWC

    params = make_params(kp, Cin, Cout)
    ref = res_block_reference(x_nhwc, params)

    # --- fp32 path: tight tolerance ---
    out32 = jax.block_until_ready(
        res_block_forward(x_nhwc, params, compute_dtype=jnp.float32))
    assert out32.shape == (N, H, W, Cout)
    err32 = jnp.max(jnp.abs(out32 - ref))
    assert jnp.allclose(out32, ref, atol=1e-4, rtol=1e-4), f"fp32 max abs err {err32}"

    # --- bf16 path (v6e / v7x production dtype): f32 accumulation, looser tolerance ---
    out16 = jax.block_until_ready(
        res_block_forward(x_nhwc, params, compute_dtype=jnp.bfloat16))
    assert out16.dtype == jnp.bfloat16
    err16 = jnp.max(jnp.abs(out16.astype(jnp.float32) - ref))
    assert err16 < 7.5e-2, f"bf16 max abs err {err16}"

    print("KERNEL_OK")
</pallas_src>

<mosaic_0001>
module attributes {stable_mosaic.version = 11 : i64} {
  func.func @resblock_kernel(%arg0: i32, %arg1: memref<1x16x128xf32, #tpu.memory_space<vmem>>, %arg2: memref<3x128x128xf32, #tpu.memory_space<vmem>>, %arg3: memref<1x128xf32, #tpu.memory_space<vmem>>, %arg4: memref<3x128x128xf32, #tpu.memory_space<vmem>>, %arg5: memref<1x128xf32, #tpu.memory_space<vmem>>, %arg6: memref<128x128xf32, #tpu.memory_space<vmem>>, %arg7: memref<1x128xf32, #tpu.memory_space<vmem>>, %arg8: memref<1x16x128xf32, #tpu.memory_space<vmem>>, %arg9: memref<1x18x128xf32, #tpu.memory_space<vmem>>, %arg10: memref<1x18x128xf32, #tpu.memory_space<vmem>>) attributes {dimension_semantics = [#tpu.dimension_semantics<parallel>], iteration_bounds = array<i64: 2>, scalar_prefetch = 0 : i64, scratch_operands = 2 : i64, tpu.core_type = #tpu.core_type<tc>, window_params = [{transform_indices = @transform_0, window_bounds = array<i64: 1, 16, 128>}, {pipeline_mode = #tpu.pipeline_mode<synchronous>, transform_indices = @transform_1, window_bounds = array<i64: 3, 128, 128>}, {pipeline_mode = #tpu.pipeline_mode<synchronous>, transform_indices = @transform_2, window_bounds = array<i64: 1, 128>}, {pipeline_mode = #tpu.pipeline_mode<synchronous>, transform_indices = @transform_3, window_bounds = array<i64: 3, 128, 128>}, {pipeline_mode = #tpu.pipeline_mode<synchronous>, transform_indices = @transform_4, window_bounds = array<i64: 1, 128>}, {pipeline_mode = #tpu.pipeline_mode<synchronous>, transform_indices = @transform_5, window_bounds = array<i64: 128, 128>}, {pipeline_mode = #tpu.pipeline_mode<synchronous>, transform_indices = @transform_6, window_bounds = array<i64: 1, 128>}, {transform_indices = @transform_7, window_bounds = array<i64: 1, 16, 128>}]} {
    %c0 = arith.constant 0 : index
    %c0_0 = arith.constant 0 : index
    %0 = vector.load %arg3[%c0, %c0_0] : memref<1x128xf32, #tpu.memory_space<vmem>>, vector<1x128xf32>
    %c0_1 = arith.constant 0 : index
    %c0_2 = arith.constant 0 : index
    %1 = vector.load %arg5[%c0_1, %c0_2] : memref<1x128xf32, #tpu.memory_space<vmem>>, vector<1x128xf32>
    %c0_3 = arith.constant 0 : index
    %c0_4 = arith.constant 0 : index
    %c0_5 = arith.constant 0 : index
    %2 = vector.load %arg1[%c0_3, %c0_4, %c0_5] : memref<1x16x128xf32, #tpu.memory_space<vmem>>, vector<1x16x128xf32>
    %c0_6 = arith.constant 0 : index
    %c1 = arith.constant 1 : index
    %c0_7 = arith.constant 0 : index
    %3 = vector.load %arg9[%c0_6, %c1, %c0_7] : memref<1x18x128xf32, #tpu.memory_space<vmem>>, vector<1x16x128xf32>
    tpu.vector_store %arg9[%c0_6, %c1, %c0_7], %2 {strides = array<i32>} : memref<1x18x128xf32, #tpu.memory_space<vmem>>, vector<1x16x128xf32>,
    %cst = arith.constant 0.000000e+00 : f32
    %4 = vector.broadcast %cst : f32 to vector<1x1x128xf32>
    %c0_8 = arith.constant 0 : index
    %c0_9 = arith.constant 0 : index
    %c0_10 = arith.constant 0 : index
    %5 = vector.load %arg9[%c0_8, %c0_9, %c0_10] : memref<1x18x128xf32, #tpu.memory_space<vmem>>, vector<1x1x128xf32>
    tpu.vector_store %arg9[%c0_8, %c0_9, %c0_10], %4 {strides = array<i32>} : memref<1x18x128xf32, #tpu.memory_space<vmem>>, vector<1x1x128xf32>,
    %c0_11 = arith.constant 0 : index
    %c17 = arith.constant 17 : index
    %c0_12 = arith.constant 0 : index
    %6 = vector.load %arg9[%c0_11, %c17, %c0_12] : memref<1x18x128xf32, #tpu.memory_space<vmem>>, vector<1x1x128xf32>
    tpu.vector_store %arg9[%c0_11, %c17, %c0_12], %4 {strides = array<i32>} : memref<1x18x128xf32, #tpu.memory_space<vmem>>, vector<1x1x128xf32>,
    %c0_13 = arith.constant 0 : index
    %c0_14 = arith.constant 0 : index
    %c0_15 = arith.constant 0 : index
    %7 = vector.load %arg9[%c0_13, %c0_14, %c0_15] : memref<1x18x128xf32, #tpu.memory_space<vmem>>, vector<1x16x128xf32>
    %8 = vector.shape_cast %7 : vector<1x16x128xf32> to vector<16x128xf32>
    %c0_16 = arith.constant 0 : index
    %c0_17 = arith.constant 0 : index
    %c0_18 = arith.constant 0 : index
    %9 = vector.load %arg2[%c0_16, %c0_17, %c0_18] : memref<3x128x128xf32, #tpu.memory_space<vmem>>, vector<1x128x128xf32>
    %10 = vector.shape_cast %9 : vector<1x128x128xf32> to vector<128x128xf32>
    %cst_19 = arith.constant dense<0.000000e+00> : vector<16x128xf32>
    %11 = tpu.matmul %8, %10, %cst_19 {dimension_numbers = #tpu.dot_dimension_numbers<[1], [0], [0], [1], [0, 0, 1, 1], [], []>} : vector<16x128xf32>, vector<128x128xf32>, vector<16x128xf32> -> vector<16x128xf32>
    %c0_20 = arith.constant 0 : index
    %c1_21 = arith.constant 1 : index
    %c0_22 = arith.constant 0 : index
    %12 = vector.load %arg9[%c0_20, %c1_21, %c0_22] : memref<1x18x128xf32, #tpu.memory_space<vmem>>, vector<1x16x128xf32>
    %13 = vector.shape_cast %12 : vector<1x16x128xf32> to vector<16x128xf32>
    %c1_23 = arith.constant 1 : index
    %c0_24 = arith.constant 0 : index
    %c0_25 = arith.constant 0 : index
    %14 = vector.load %arg2[%c1_23, %c0_24, %c0_25] : memref<3x128x128xf32, #tpu.memory_space<vmem>>, vector<1x128x128xf32>
    %15 = vector.shape_cast %14 : vector<1x128x128xf32> to vector<128x128xf32>
    %cst_26 = arith.constant dense<0.000000e+00> : vector<16x128xf32>
    %16 = tpu.matmul %13, %15, %cst_26 {dimension_numbers = #tpu.dot_dimension_numbers<[1], [0], [0], [1], [0, 0, 1, 1], [], []>} : vector<16x128xf32>, vector<128x128xf32>, vector<16x128xf32> -> vector<16x128xf32>
    %17 = arith.addf %11, %16 : vector<16x128xf32>
    %c0_27 = arith.constant 0 : index
    %c2 = arith.constant 2 : index
    %c0_28 = arith.constant 0 : index
    %18 = vector.load %arg9[%c0_27, %c2, %c0_28] : memref<1x18x128xf32, #tpu.memory_space<vmem>>, vector<1x16x128xf32>
    %19 = vector.shape_cast %18 : vector<1x16x128xf32> to vector<16x128xf32>
    %c2_29 = arith.constant 2 : index
    %c0_30 = arith.constant 0 : index
    %c0_31 = arith.constant 0 : index
    %20 = vector.load %arg2[%c2_29, %c0_30, %c0_31] : memref<3x128x128xf32, #tpu.memory_space<vmem>>, vector<1x128x128xf32>
    %21 = vector.shape_cast %20 : vector<1x128x128xf32> to vector<128x128xf32>
    %cst_32 = arith.constant dense<0.000000e+00> : vector<16x128xf32>
    %22 = tpu.matmul %19, %21, %cst_32 {dimension_numbers = #tpu.dot_dimension_numbers<[1], [0], [0], [1], [0, 0, 1, 1], [], []>} : vector<16x128xf32>, vector<128x128xf32>, vector<16x128xf32> -> vector<16x128xf32>
    %23 = arith.addf %17, %22 : vector<16x128xf32>
    %24 = vector.broadcast %0 : vector<1x128xf32> to vector<16x128xf32>
    %25 = arith.addf %23, %24 : vector<16x128xf32>
    %cst_33 = arith.constant 0.000000e+00 : f32
    %26 = vector.broadcast %cst_33 : f32 to vector<16x128xf32>
    %27 = arith.maximumf %25, %26 : vector<16x128xf32>
    %28 = vector.shape_cast %27 : vector<16x128xf32> to vector<1x16x128xf32>
    %c0_34 = arith.constant 0 : index
    %c1_35 = arith.constant 1 : index
    %c0_36 = arith.constant 0 : index
    %29 = vector.load %arg10[%c0_34, %c1_35, %c0_36] : memref<1x18x128xf32, #tpu.memory_space<vmem>>, vector<1x16x128xf32>
    tpu.vector_store %arg10[%c0_34, %c1_35, %c0_36], %28 {strides = array<i32>} : memref<1x18x128xf32, #tpu.memory_space<vmem>>, vector<1x16x128xf32>,
    %cst_37 = arith.constant 0.000000e+00 : f32
    %30 = vector.broadcast %cst_37 : f32 to vector<1x1x128xf32>
    %c0_38 = arith.constant 0 : index
    %c0_39 = arith.constant 0 : index
    %c0_40 = arith.constant 0 : index
    %31 = vector.load %arg10[%c0_38, %c0_39, %c0_40] : memref<1x18x128xf32, #tpu.memory_space<vmem>>, vector<1x1x128xf32>
    tpu.vector_store %arg10[%c0_38, %c0_39, %c0_40], %30 {strides = array<i32>} : memref<1x18x128xf32, #tpu.memory_space<vmem>>, vector<1x1x128xf32>,
    %c0_41 = arith.constant 0 : index
    %c17_42 = arith.constant 17 : index
    %c0_43 = arith.constant 0 : index
    %32 = vector.load %arg10[%c0_41, %c17_42, %c0_43] : memref<1x18x128xf32, #tpu.memory_space<vmem>>, vector<1x1x128xf32>
    tpu.vector_store %arg10[%c0_41, %c17_42, %c0_43], %30 {strides = array<i32>} : memref<1x18x128xf32, #tpu.memory_space<vmem>>, vector<1x1x128xf32>,
    %c0_44 = arith.constant 0 : index
    %c0_45 = arith.constant 0 : index
    %c0_46 = arith.constant 0 : index
    %33 = vector.load %arg10[%c0_44, %c0_45, %c0_46] : memref<1x18x128xf32, #tpu.memory_space<vmem>>, vector<1x16x128xf32>
    %34 = vector.shape_cast %33 : vector<1x16x128xf32> to vector<16x128xf32>
    %c0_47 = arith.constant 0 : index
    %c0_48 = arith.constant 0 : index
    %c0_49 = arith.constant 0 : index
    %35 = vector.load %arg4[%c0_47, %c0_48, %c0_49] : memref<3x128x128xf32, #tpu.memory_space<vmem>>, vector<1x128x128xf32>
    %36 = vector.shape_cast %35 : vector<1x128x128xf32> to vector<128x128xf32>
    %cst_50 = arith.constant dense<0.000000e+00> : vector<16x128xf32>
    %37 = tpu.matmul %34, %36, %cst_50 {dimension_numbers = #tpu.dot_dimension_numbers<[1], [0], [0], [1], [0, 0, 1, 1], [], []>} : vector<16x128xf32>, vector<128x128xf32>, vector<16x128xf32> -> vector<16x128xf32>
    %c0_51 = arith.constant 0 : index
    %c1_52 = arith.constant 1 : index
    %c0_53 = arith.constant 0 : index
    %38 = vector.load %arg10[%c0_51, %c1_52, %c0_53] : memref<1x18x128xf32, #tpu.memory_space<vmem>>, vector<1x16x128xf32>
    %39 = vector.shape_cast %38 : vector<1x16x128xf32> to vector<16x128xf32>
    %c1_54 = arith.constant 1 : index
    %c0_55 = arith.constant 0 : index
    %c0_56 = arith.constant 0 : index
    %40 = vector.load %arg4[%c1_54, %c0_55, %c0_56] : memref<3x128x128xf32, #tpu.memory_space<vmem>>, vector<1x128x128xf32>
    %41 = vector.shape_cast %40 : vector<1x128x128xf32> to vector<128x128xf32>
    %cst_57 = arith.constant dense<0.000000e+00> : vector<16x128xf32>
    %42 = tpu.matmul %39, %41, %cst_57 {dimension_numbers = #tpu.dot_dimension_numbers<[1], [0], [0], [1], [0, 0, 1, 1], [], []>} : vector<16x128xf32>, vector<128x128xf32>, vector<16x128xf32> -> vector<16x128xf32>
    %43 = arith.addf %37, %42 : vector<16x128xf32>
    %c0_58 = arith.constant 0 : index
    %c2_59 = arith.constant 2 : index
    %c0_60 = arith.constant 0 : index
    %44 = vector.load %arg10[%c0_58, %c2_59, %c0_60] : memref<1x18x128xf32, #tpu.memory_space<vmem>>, vector<1x16x128xf32>
    %45 = vector.shape_cast %44 : vector<1x16x128xf32> to vector<16x128xf32>
    %c2_61 = arith.constant 2 : index
    %c0_62 = arith.constant 0 : index
    %c0_63 = arith.constant 0 : index
    %46 = vector.load %arg4[%c2_61, %c0_62, %c0_63] : memref<3x128x128xf32, #tpu.memory_space<vmem>>, vector<1x128x128xf32>
    %47 = vector.shape_cast %46 : vector<1x128x128xf32> to vector<128x128xf32>
    %cst_64 = arith.constant dense<0.000000e+00> : vector<16x128xf32>
    %48 = tpu.matmul %45, %47, %cst_64 {dimension_numbers = #tpu.dot_dimension_numbers<[1], [0], [0], [1], [0, 0, 1, 1], [], []>} : vector<16x128xf32>, vector<128x128xf32>, vector<16x128xf32> -> vector<16x128xf32>
    %49 = arith.addf %43, %48 : vector<16x128xf32>
    %50 = vector.broadcast %1 : vector<1x128xf32> to vector<16x128xf32>
    %51 = arith.addf %49, %50 : vector<16x128xf32>
    %c0_65 = arith.constant 0 : index
    %c0_66 = arith.constant 0 : index
    %c0_67 = arith.constant 0 : index
    %52 = vector.load %arg1[%c0_65, %c0_66, %c0_67] : memref<1x16x128xf32, #tpu.memory_space<vmem>>, vector<1x16x128xf32>
    %53 = vector.shape_cast %52 : vector<1x16x128xf32> to vector<16x128xf32>
    %c0_68 = arith.constant 0 : index
    %c0_69 = arith.constant 0 : index
    %54 = vector.load %arg6[%c0_68, %c0_69] : memref<128x128xf32, #tpu.memory_space<vmem>>, vector<128x128xf32>
    %cst_70 = arith.constant dense<0.000000e+00> : vector<16x128xf32>
    %55 = tpu.matmul %53, %54, %cst_70 {dimension_numbers = #tpu.dot_dimension_numbers<[1], [0], [0], [1], [0, 0, 1, 1], [], []>} : vector<16x128xf32>, vector<128x128xf32>, vector<16x128xf32> -> vector<16x128xf32>
    %c0_71 = arith.constant 0 : index
    %c0_72 = arith.constant 0 : index
    %56 = vector.load %arg7[%c0_71, %c0_72] : memref<1x128xf32, #tpu.memory_space<vmem>>, vector<1x128xf32>
    %57 = vector.broadcast %56 : vector<1x128xf32> to vector<16x128xf32>
    %58 = arith.addf %55, %57 : vector<16x128xf32>
    %59 = arith.addf %51, %58 : vector<16x128xf32>
    %cst_73 = arith.constant 0.000000e+00 : f32
    %60 = vector.broadcast %cst_73 : f32 to vector<16x128xf32>
    %61 = arith.maximumf %59, %60 : vector<16x128xf32>
    %62 = vector.shape_cast %61 : vector<16x128xf32> to vector<1x16x128xf32>
    %c0_74 = arith.constant 0 : index
    %c0_75 = arith.constant 0 : index
    %c0_76 = arith.constant 0 : index
    %63 = vector.load %arg8[%c0_74, %c0_75, %c0_76] : memref<1x16x128xf32, #tpu.memory_space<vmem>>, vector<1x16x128xf32>
    tpu.vector_store %arg8[%c0_74, %c0_75, %c0_76], %62 {strides = array<i32>} : memref<1x16x128xf32, #tpu.memory_space<vmem>>, vector<1x16x128xf32>,
    return
  }
  func.func @transform_0(%arg0: i32) -> (i32, i32, i32) {
    %c0_i32 = arith.constant 0 : i32
    %c0_i32_0 = arith.constant 0 : i32
    %c0_i32_1 = arith.constant 0 : i32
    return %arg0, %c0_i32, %c0_i32_0 : i32, i32, i32
  }
  func.func @transform_1(%arg0: i32) -> (i32, i32, i32) {
    %c0_i32 = arith.constant 0 : i32
    %c0_i32_0 = arith.constant 0 : i32
    %c0_i32_1 = arith.constant 0 : i32
    %c0_i32_2 = arith.constant 0 : i32
    return %c0_i32, %c0_i32_0, %c0_i32_1 : i32, i32, i32
  }
  func.func @transform_2(%arg0: i32) -> (i32, i32) {
    %c0_i32 = arith.constant 0 : i32
    %c0_i32_0 = arith.constant 0 : i32
    %c0_i32_1 = arith.constant 0 : i32
    return %c0_i32, %c0_i32_0 : i32, i32
  }
  func.func @transform_3(%arg0: i32) -> (i32, i32, i32) {
    %c0_i32 = arith.constant 0 : i32
    %c0_i32_0 = arith.constant 0 : i32
    %c0_i32_1 = arith.constant 0 : i32
    %c0_i32_2 = arith.constant 0 : i32
    return %c0_i32, %c0_i32_0, %c0_i32_1 : i32, i32, i32
  }
  func.func @transform_4(%arg0: i32) -> (i32, i32) {
    %c0_i32 = arith.constant 0 : i32
    %c0_i32_0 = arith.constant 0 : i32
    %c0_i32_1 = arith.constant 0 : i32
    return %c0_i32, %c0_i32_0 : i32, i32
  }
  func.func @transform_5(%arg0: i32) -> (i32, i32) {
    %c0_i32 = arith.constant 0 : i32
    %c0_i32_0 = arith.constant 0 : i32
    %c0_i32_1 = arith.constant 0 : i32
    return %c0_i32, %c0_i32_0 : i32, i32
  }
  func.func @transform_6(%arg0: i32) -> (i32, i32) {
    %c0_i32 = arith.constant 0 : i32
    %c0_i32_0 = arith.constant 0 : i32
    %c0_i32_1 = arith.constant 0 : i32
    return %c0_i32, %c0_i32_0 : i32, i32
  }
  func.func @transform_7(%arg0: i32) -> (i32, i32, i32) {
    %c0_i32 = arith.constant 0 : i32
    %c0_i32_0 = arith.constant 0 : i32
    %c0_i32_1 = arith.constant 0 : i32
    return %arg0, %c0_i32, %c0_i32_0 : i32, i32, i32
  }
}

</mosaic_0001>

<bundles_post_ra>
// kernel: tpu_custom_call.1
= control target key start
LH: loop header
LB: loop body
LE: loop exit
PB: predicated region body
PF: predicated region fallthrough
CT: control target
= control target key end

     0   :  { %s2106_s0 = inlined_call_operand.hbm [shape: f32[2,16,128], index: 0, kind: input, shape index: {}]   ;;  %s2107_s1 = inlined_call_operand.hbm [shape: f32[3,128,128], index: 1, kind: input, shape index: {}]   ;;  %s2108_s2 = inlined_call_operand.vmem [shape: f32[1,128], index: 2, kind: input, shape index: {}]   ;;  %s2109_s3 = inlined_call_operand.hbm [shape: f32[3,128,128], index: 3, kind: input, shape index: {}]   ;;  %s2110_s4 = inlined_call_operand.vmem [shape: f32[1,128], index: 4, kind: input, shape index: {}]   ;;  %s2111_s5 = inlined_call_operand.hbm [shape: f32[128,128], index: 5, kind: input, shape index: {}]   ;;  %s2112_s6 = inlined_call_operand.vmem [shape: f32[1,128], index: 6, kind: input, shape index: {}]   ;;  %s2113_s7 = inlined_call_operand.hbm [shape: f32[2,16,128], index: 7, kind: output, shape index: {}]  }
   0x1   :  { %2120 = sst [smem:[#allocation17_spill]] %s2107_s1 }
   0x2   :  { %12 = vsyncpa [#allocation5], 0 }
   0x3   :  { %14 = vsyncpa [#allocation5 + $0x1], 0 }
   0x4   :  { %15 = vsyncpa [#allocation8], 0 }
   0x5   :  { %16 = vsyncpa [#allocation11], 0 }
   0x6   :  { %17 = vsyncpa [#allocation6], 0 }
   0x7   :  { %19 = vsyncpa [#allocation6 + $0x1], 0  ;;  %s1867_s24 = smov 0   ;;  %s1869_s25 = smov 0  }
   0x8   :  { %s1871_s26 = smov 0   ;;  %s1873_s27 = smov 0  }
   0x9 LB: > { %s1888_s28 = sadd.s32 4294967295, %s1815_s27   ;;  %s1159_s29 = sadd.s32 4294967294, %s1815_s27   ;;  %s1815_s27 = sphi %s1873_s27, %s2142_s27   ;;  %s1811_s26 = sphi %s1871_s26, %s2141_s26   ;;  %s1807_s25 = sphi %s1869_s25, %s2140_s25   ;;  %s1803_s24 = sphi %s1867_s24, %s2139_s24  }
   0xa   : > { %p45_p0 = scmp.ne.s32.totalorder %s1807_s25, %s1803_s24  ;;  %p2114_p1 = scmp.eq.s32.totalorder %s1888_s28, 0 }
   0xb   : > { %p195_p2 = scmp.eq.s32.totalorder %s1888_s28, 1  ;;  %p201_p3 = scmp.eq.s32.totalorder %s1159_s29, 1 }
   0xc   : > { %p1897_p4 = por %p2114_p1, %p45_p0  ;;  %p1160_p5 = scmp.ge.s32.totalorder %s1815_s27, 1 }
   0xd   : > { %p1902_p6 = por %p201_p3, %p45_p0  ;;  %p208_p7 = scmp.lt.s32.totalorder %s1815_s27, 3 }
   0xe   : > { %s2121_s30 = scalar_select %p1897_p4, 1, 0 }
   0xf   : > { %s2122_s8 = scalar_select %p1902_p6, 1, 0 }
  0x10   : > { %p1907_p8 = pnand %p1160_p5, %p208_p7  ;;  %s1817_s10 = smov [#allocation7]  }
  0x11   : > { %s220_s11 = sshll.u32 %s1817_s10, 4  ;;  %s1818_s13 = smov [#allocation9]   ;;  %s221_s11 = int_to_ptr.vmem [resolvable:$true] %s220_s11 }
  0x12   : > { %s2123_s9 = scalar_select %p1907_p8, 1, 0 }
  0x13   : > { %p1571_p9 = pneg %p1907_p8  ;;  %s236_s14 = sshll.u32 %s1818_s13, 4  ;;  %s237_s14 = int_to_ptr.vmem [resolvable:$true] %s236_s14 }
  0x14   : > { %s1819_s15 = smov [#allocation10]   ;;  %s1648_s17 = scalar_lea.vmem %s221_s11, 6144 }
  0x15   : > { %p1916_p11 = pnand %p1571_p9, %p2114_p1  ;;  %s252_s16 = sshll.u32 %s1819_s15, 4  ;;  %s253_s16 = int_to_ptr.vmem [resolvable:$true] %s252_s16 }
  0x16   : > { %p1649_p13 = scmp.ne.s32.totalorder %s221_s11, %s1648_s17  ;;  %p1656_p5 = scmp.lt.s32.totalorder %s221_s11, %s221_s11 }
  0x17   : > { %p1639_p12 = pneg %p1916_p11  ;;  %p1657_p7 = scmp.lt.s32.totalorder %s1648_s17, %s1648_s17 }
  0x19   : > { %p1651_p0 = pnand %p1649_p13, %p1639_p12  ;;  %p1658_p9 = por %p1657_p7, %p1656_p5 }
  0x1b   : > { %p1652_p3 = pneg %p1651_p0 }
  0x1d   : > { %p1659_p10 = pnand %p1658_p9, %p1652_p3 }
  0x1f   : > { %1662 = shalt.err (!%p1659_p10)
}
  0x20   : > { %s2115_s18 = smov 128   ;;  %s2116_s19 = smov 8  }
  0x21   : > { %s2125_s1 = sld [smem:[#allocation17_spill]]  ;;  %s1674_s22 = scalar_lea.vmem %s237_s14, 6144 }
  0x22   : > { %p1675_p13 = scmp.ne.s32.totalorder %s237_s14, %s1674_s22  ;;  %p1682_p3 = scmp.lt.s32.totalorder %s237_s14, %s237_s14 }
  0x23   : > { %p1683_p10 = scmp.lt.s32.totalorder %s1674_s22, %s1674_s22 }
  0x24   : > { %p1677_p0 = pnand %p1675_p13, %p1639_p12 }
  0x25   : > { %p1684_p7 = por %p1683_p10, %p1682_p3 }
  0x26   : > { %p1678_p5 = pneg %p1677_p0 }
  0x27   : > { %1574 = dma.hbm_to_vmem [thread:$0]  (!%p1916_p11), %s2125_s1, 6144, %s221_s11, [#allocation8], %s2115_s18, %s2115_s18, %s2116_s19  }
  0x28   : > { %p1685_p9 = pnand %p1684_p7, %p1678_p5 }
  0x2a   : > { %1688 = shalt.err (!%p1685_p9)
}
  0x2b   : > { %1577 = dma.hbm_to_vmem [thread:$0]  (!%p1916_p11), %s2109_s3, 6144, %s237_s14, [#allocation8], %s2115_s18, %s2115_s18, %s2116_s19  }
  0x2c   : > { %s1700_s10 = scalar_lea.vmem %s253_s16, 2048  ;;  %p1708_p3 = scmp.lt.s32.totalorder %s253_s16, %s253_s16 }
  0x2d   : > { %p1701_p1 = scmp.ne.s32.totalorder %s253_s16, %s1700_s10  ;;  %p1709_p5 = scmp.lt.s32.totalorder %s1700_s10, %s1700_s10 }
  0x2f   : > { %p1703_p13 = pnand %p1701_p1, %p1639_p12  ;;  %p1710_p10 = por %p1709_p5, %p1708_p3 }
  0x31   : > { %p1704_p0 = pneg %p1703_p13 }
  0x33   : > { %p1711_p7 = pnand %p1710_p10, %p1704_p0 }
  0x35   : > { %1714 = shalt.err (!%p1711_p7)
}
  0x36   : > { %1580 = dma.hbm_to_vmem [thread:$0]  (!%p1916_p11), %s2111_s5, 2048, %s253_s16, [#allocation11], %s2115_s18, %s2115_s18, %s2116_s19  }
  0x37   : > { %s1956_s14 = sadd.s32 1, %s1815_s27   ;;  %s32_s15 = sadd.s32 1, %s1811_s26 }
  0x38   : > { %s29_s12 = ssub.s32 %s1815_s27, %s1956_s14  ;;  %p39_p12 = scmp.ne.s32.totalorder %s1811_s26, %s1807_s25 }
  0x39   : > { %p30_p1 = scmp.eq.s32.totalorder %s29_s12, 0  ;;  %p40_p9 = scmp.eq.s32.totalorder %s1815_s27, 0 }
  0x3a   : > { %p1592_p13 = scmp.lt.s32.totalorder %s1815_s27, 2  ;;  %p1970_p3 = por %p195_p2, %p39_p12 }
  0x3b   : > { %s1966_s17 = scalar_select %p30_p1, %s1811_s26, %s32_s15  }
  0x3c   : > { %p41_p0 = por %p40_p9, %p39_p12  ;;  %s269_s21 = sand.u32 1, %s1811_s26  }
  0x3d   : > { %s2126_s20 = scalar_select %p1970_p3, 1, 0 }
  0x3e   : > { %s1182_s22 = sshll.u32 %s1815_s27, 8  ;;  %s1165_s16 = sshll.u32 %s269_s21, 4 }
  0x3f   : > { %s1979_s10 = scalar_lea.hbm %s2106_s0, %s1182_s22  ;;  %s273_s11 = scalar_lea.vmem [#allocation4], %s1165_s16 }
  0x40   : > { %s280_s13 = sshll.u32 %s273_s11, 4  ;;  %p1981_p11 = pnand %p1592_p13, %p41_p0  ;;  %s1985_s13 = int_to_ptr.vmem [resolvable:$true] %s280_s13 }
  0x41   : > { %s1987_s15 = scalar_lea.sflag [#allocation5], %s269_s21  ;;  %s1715_s18 = scalar_lea.hbm %s1979_s10, 256 }
  0x42   : > { %p1716_p2 = scmp.ne.s32.totalorder %s1979_s10, %s1715_s18  ;;  %p1717_p5 = pneg %p1981_p11 }
  0x43   : > { %s1720_s16 = scalar_lea.hbm %s2106_s0, 512  ;;  %p1721_p1 = scmp.lt.s32.totalorder %s1979_s10, %s2106_s0 }
  0x44   : > { %p1718_p10 = pnand %p1717_p5, %p1716_p2  ;;  %p1722_p12 = scmp.lt.s32.totalorder %s1720_s16, %s1715_s18 }
  0x46   : > { %p1719_p7 = pneg %p1718_p10  ;;  %p1723_p9 = por %p1722_p12, %p1721_p1 }
  0x48   : > { %p1724_p13 = pnand %p1723_p9, %p1719_p7 }
  0x4a   : > { %1727 = shalt.err (!%p1724_p13)
}
  0x4b   : > { %s1728_s21 = scalar_lea.vmem %s1985_s13, 256  ;;  %s1822_s19 = smov [#allocation4]  }
  0x4c   : > { %p1729_p0 = scmp.ne.s32.totalorder %s1985_s13, %s1728_s21  ;;  %s1733_s1 = sshll.u32 %s1822_s19, 4  ;;  %s1734_s1 = int_to_ptr.vmem [resolvable:$false] %s1733_s1 }
  0x4d   : > { %s1735_s22 = scalar_lea.vmem %s1734_s1, 512  ;;  %p1736_p10 = scmp.lt.s32.totalorder %s1985_s13, %s1734_s1 }
  0x4e   : > { %p1731_p6 = pnand %p1729_p0, %p1717_p5  ;;  %p1737_p3 = scmp.lt.s32.totalorder %s1735_s22, %s1728_s21 }
  0x50   : > { %p1732_p2 = pneg %p1731_p6  ;;  %p1738_p4 = por %p1737_p3, %p1736_p10 }
  0x52   : > { %p1739_p8 = pnand %p1738_p4, %p1732_p2 }
  0x54   : > { %1742 = shalt.err (!%p1739_p8)
}
  0x55   : > { %s2128_s18 = smov 8   ;;  %s2129_s23 = smov 128  }
  0x56   : > { %1584 = dma.hbm_to_vmem [thread:$0]  (!%p1981_p11), %s1979_s10, 256, %s1985_s13, %s1987_s15, %s2129_s23, %s2129_s23, %s2128_s18  }
  0x57   : > { %p2130_p6 = scmp.ne.s32.totalorder %s2123_s9, 0 }
  0x58   : > { %s2014_s19 = sand.u32 (!%p2130_p6), 1, %s1807_s25   ;;  %p2131_p4 = scmp.ne.s32.totalorder (!%p2130_p6), %s2121_s30, 0 }
  0x59   : > { %292 = sbr.rel (%p2130_p6) target bundleno = 626 (0x272), region = 48  ;;  %s1169_s1 = sshll.u32 (!%p2130_p6), %s2014_s19, 4 }
  0x5a   : > { %s295_s16 = scalar_lea.sflag (!%p2130_p6), [#allocation5], %s2014_s19  ;;  %s2020_s12 = scalar_lea.vmem (!%p2130_p6), [#allocation4], %s1169_s1 }
  0x5e   : > { %1786 = dma.done.wait (%p2131_p4), %s295_s16, 256  }
  0x5f   : > { %1788 = vsyncadd (%p2131_p4), %s295_s16, 4294967040  ;;  %p2132_p8 = scmp.eq.s32.totalorder %s1888_s28, 0 }
  0x61   : > { %1790 = dma.done.wait (%p2132_p8), [#allocation8], 12288   ;;  %p2133_p3 = pmov %p2132_p8 }
  0x63   : > { %1792 = vsyncadd (%p2133_p3), [#allocation8], 4294955008  ;;  %p2134_p11 = pmov %p2133_p3 }
  0x64   : > { %p2135_p5 = pmov %p2133_p3 }
  0x65   : > { %1794 = dma.done.wait (%p2134_p11), [#allocation11], 2048  }
  0x66   : > { %1796 = vsyncadd (%p2135_p5), [#allocation11], 4294965248  ;;  %v1823_v0 = vmov 0.0   ;;  %v385_v1 = vld [vmem:[#allocation7 + $0xf8] sm:$0xff]  ;;  %v384_v3 = vld [vmem:[#allocation7 + $0xf0] sm:$0xff]  ;;  %s340_s11 = scalar_lea.vmem [#allocation12], %s1169_s1 }
  0x67   : > { %347 = vst [vmem:[#allocation2] sm:$0x1] %v1823_v0  ;;  %348 = vst [vmem:[#allocation2 + $0x11] sm:$0x1] %v1823_v0  ;;  %v366_v2 = vld [vmem:[#allocation7 + $0x78] sm:$0xff]  ;;  %1310 = vmatprep.subr.mxu0 %v385_v1  ;;  %v365_v4 = vld [vmem:[#allocation7 + $0x70] sm:$0xff] }
  0x68   : > { %644 = vst [vmem:[#allocation3] sm:$0x1] %v1823_v0  ;;  %645 = vst [vmem:[#allocation3 + $0x11] sm:$0x1] %v1823_v0  ;;  %1345 = vmatprep.subr.mxu1 %v366_v2  ;;  %1311 = vmatpush3.msra.mxu0 %v385_v1  ;;  %v383_v5 = vld [vmem:[#allocation7 + $0xe8] sm:$0xff]  ;;  %v382_v7 = vld [vmem:[#allocation7 + $0xe0] sm:$0xff] }
  0x69   : > { %1346 = vmatpush3.msra.mxu1 %v366_v2  ;;  %v364_v6 = vld [vmem:[#allocation7 + $0x68] sm:$0xff]  ;;  %1312 = vmatprep.subr.mxu0 %v384_v3  ;;  %v363_v8 = vld [vmem:[#allocation7 + $0x60] sm:$0xff]  ;;  %v381_v9 = vld [vmem:[#allocation7 + $0xd8] sm:$0xff]  ;;  %s1057_s21 = sshll.u32 %s340_s11, 4  ;;  %s1183_s22 = sshll.u32 %s1888_s28, 8  ;;  %s2058_s21 = int_to_ptr.vmem [resolvable:$true] %s1057_s21 }
  0x6a   : > { %1347 = vmatprep.subr.mxu1 %v365_v4  ;;  %1313 = vmatpush3.msra.mxu0 %v384_v3  ;;  %v362_v10 = vld [vmem:[#allocation7 + $0x58] sm:$0xff]  ;;  %v380_v11 = vld [vmem:[#allocation7 + $0xd0] sm:$0xff]  ;;  %v379_v13 = vld [vmem:[#allocation7 + $0xc8] sm:$0xff]  ;;  %s2063_s16 = scalar_lea.hbm %s2113_s7, %s1183_s22  ;;  %s1044_s1 = scalar_lea.sflag [#allocation6], %s2014_s19 }
  0x6b   : > { %1348 = vmatpush3.msra.mxu1 %v365_v4  ;;  %1314 = vmatprep.subr.mxu0 %v383_v5  ;;  %v361_v12 = vld [vmem:[#allocation7 + $0x50] sm:$0xff]  ;;  %v360_v14 = vld [vmem:[#allocation7 + $0x48] sm:$0xff]  ;;  %v378_v17 = vld [vmem:[#allocation7 + $0xc0] sm:$0xff]  ;;  %p2136_p1 = scmp.ne.s32.totalorder %s2126_s20, 0  ;;  %s1824_s28 = smov [#allocation12]  }
  0x6c   : > { %1349 = vmatprep.subr.mxu1 %v364_v6  ;;  %1315 = vmatpush3.msra.mxu0 %v383_v5  ;;  %v2035_v15 = vld [vmem:[%s2020_s12] sm:$0xff]  ;;  %v2039_v16 = vld [vmem:[%s2020_s12 + $0x8] sm:$0xff]  ;;  %s1743_s12 = scalar_lea.vmem %s2058_s21, 256  ;;  %s1747_s30 = sshll.u32 %s1824_s28, 4  ;;  %s1748_s30 = int_to_ptr.vmem [resolvable:$false] %s1747_s30 }
  0x6d   : > { %1350 = vmatpush3.msra.mxu1 %v364_v6  ;;  %1316 = vmatprep.subr.mxu0 %v382_v7  ;;  %345 = vst [vmem:[#allocation2 + $0x1] sm:$0xff] %v2035_v15  ;;  %v359_v18 = vld [vmem:[#allocation7 + $0x40] sm:$0xff]  ;;  %346 = vst [vmem:[#allocation2 + $0x9] sm:$0xff] %v2039_v16  ;;  %v377_v19 = vld [vmem:[#allocation7 + $0xb8] sm:$0xff]  ;;  %p1744_p7 = scmp.ne.s32.totalorder %s2058_s21, %s1743_s12  ;;  %s1749_s9 = scalar_lea.vmem %s1748_s30, 512 }
  0x6e   : > { %1351 = vmatprep.subr.mxu1 %v363_v8  ;;  %1317 = vmatpush3.msra.mxu0 %v382_v7  ;;  %v358_v20 = vld [vmem:[#allocation7 + $0x38] sm:$0xff]  ;;  %v376_v21 = vld [vmem:[#allocation7 + $0xb0] sm:$0xff]  ;;  %v375_v23 = vld [vmem:[#allocation7 + $0xa8] sm:$0xff]  ;;  %p1750_p13 = scmp.lt.s32.totalorder %s2058_s21, %s1748_s30  ;;  %p1751_p0 = scmp.lt.s32.totalorder %s1749_s9, %s1743_s12 }
  0x6f   : > { %1352 = vmatpush3.msra.mxu1 %v363_v8  ;;  %1318 = vmatprep.subr.mxu0 %v381_v9  ;;  %v357_v22 = vld [vmem:[#allocation7 + $0x30] sm:$0xff]  ;;  %v356_v24 = vld [vmem:[#allocation7 + $0x28] sm:$0xff]  ;;  %v374_v25 = vld [vmem:[#allocation7 + $0xa0] sm:$0xff]  ;;  %p1745_p12 = pnand %p1744_p7, %p2136_p1 }
  0x70   : > { %1353 = vmatprep.subr.mxu1 %v362_v10  ;;  %1319 = vmatpush3.msra.mxu0 %v381_v9  ;;  %v355_v26 = vld [vmem:[#allocation7 + $0x20] sm:$0xff]  ;;  %v373_v27 = vld [vmem:[#allocation7 + $0x98] sm:$0xff]  ;;  %v372_v29 = vld [vmem:[#allocation7 + $0x90] sm:$0xff]  ;;  %p1752_p2 = por %p1751_p0, %p1750_p13 }
  0x71   : > { %1354 = vmatpush3.msra.mxu1 %v362_v10  ;;  %1320 = vmatprep.subr.mxu0 %v380_v11  ;;  %v354_v28 = vld [vmem:[#allocation7 + $0x18] sm:$0xff]  ;;  %v353_v30 = vld [vmem:[#allocation7 + $0x10] sm:$0xff]  ;;  %v371_v31 = vld [vmem:[#allocation7 + $0x88] sm:$0xff]  ;;  %p1746_p9 = pneg %p1745_p12 }
  0x72   : > { %1355 = vmatprep.subr.mxu1 %v361_v12  ;;  %1321 = vmatpush3.msra.mxu0 %v380_v11  ;;  %v352_v32 = vld [vmem:[#allocation7 + $0x8] sm:$0xff]  ;;  %v370_v33 = vld [vmem:[#allocation7 + $0x80] sm:$0xff]  ;;  %v554_v37 = vld [vmem:[#allocation7 + $0x178] sm:$0xff] }
  0x73   : > { %1356 = vmatpush3.msra.mxu1 %v361_v12  ;;  %1322 = vmatprep.subr.mxu0 %v379_v13  ;;  %v351_v34 = vld [vmem:[#allocation7] sm:$0xff]  ;;  %v553_v39 = vld [vmem:[#allocation7 + $0x170] sm:$0xff]  ;;  %v552_v40 = vld [vmem:[#allocation7 + $0x168] sm:$0xff]  ;;  %p1753_p10 = pnand %p1752_p2, %p1746_p9 }
  0x74   : > { %1357 = vmatprep.subr.mxu1 %v360_v14  ;;  %1323 = vmatpush3.msra.mxu0 %v379_v13  ;;  %v349_v35 = vld [vmem:[#allocation2] sm:$0xff]  ;;  %v350_v36 = vld [vmem:[#allocation2 + $0x8] sm:$0xff]  ;;  %v551_v41 = vld [vmem:[#allocation7 + $0x160] sm:$0xff] }
  0x75   : > { %1358 = vmatpush3.msra.mxu1 %v360_v14  ;;  %1324 = vmatprep.subr.mxu0 %v378_v17  ;;  %v536_v38 = vld [vmem:[#allocation2 + $0x2] sm:$0xff]  ;;  %v548_v44 = vld [vmem:[#allocation7 + $0x148] sm:$0xff]  ;;  %v547_v45 = vld [vmem:[#allocation7 + $0x140] sm:$0xff] }
  0x76   : > { %1359 = vmatprep.subr.mxu1 %v359_v18  ;;  %1325 = vmatpush3.msra.mxu0 %v378_v17  ;;  %v550_v42 = vld [vmem:[#allocation7 + $0x158] sm:$0xff]  ;;  %v549_v43 = vld [vmem:[#allocation7 + $0x150] sm:$0xff]  ;;  %v544_v48 = vld [vmem:[#allocation7 + $0x128] sm:$0xff] }
  0x77   : > { %1360 = vmatpush3.msra.mxu1 %v359_v18  ;;  %1326 = vmatprep.subr.mxu0 %v377_v19  ;;  %v546_v46 = vld [vmem:[#allocation7 + $0x138] sm:$0xff]  ;;  %v545_v47 = vld [vmem:[#allocation7 + $0x130] sm:$0xff]  ;;  %v543_v49 = vld [vmem:[#allocation7 + $0x120] sm:$0xff] }
  0x78   : > { %1361 = vmatprep.subr.mxu1 %v358_v20  ;;  %1327 = vmatpush3.msra.mxu0 %v377_v19  ;;  %v542_v50 = vld [vmem:[#allocation7 + $0x118] sm:$0xff]  ;;  %v541_v51 = vld [vmem:[#allocation7 + $0x110] sm:$0xff]  ;;  %v540_v52 = vld [vmem:[#allocation7 + $0x108] sm:$0xff] }
  0x79   : > { %1362 = vmatpush3.msra.mxu1 %v358_v20  ;;  %1328 = vmatprep.subr.mxu0 %v376_v21  ;;  %v539_v53 = vld [vmem:[#allocation7 + $0x100] sm:$0xff]  ;;  %v682_v55 = vld [vmem:[#allocation9 + $0xf8] sm:$0xff]  ;;  %v681_v57 = vld [vmem:[#allocation9 + $0xf0] sm:$0xff] }
  0x7a   : > { %1363 = vmatprep.subr.mxu1 %v357_v22  ;;  %1329 = vmatpush3.msra.mxu0 %v376_v21  ;;  %v537_v54 = vld [vmem:[#allocation2 + $0xa] sm:$0xff]  ;;  %v662_v58 = vld [vmem:[#allocation9 + $0x70] sm:$0xff]  ;;  %v680_v59 = vld [vmem:[#allocation9 + $0xe8] sm:$0xff] }
  0x7b   : > { %1364 = vmatpush3.msra.mxu1 %v357_v22  ;;  %1330 = vmatprep.subr.mxu0 %v375_v23  ;;  %v663_v56 = vld [vmem:[#allocation9 + $0x78] sm:$0xff]  ;;  %v661_v60 = vld [vmem:[#allocation9 + $0x68] sm:$0xff]  ;;  %v679_v61 = vld [vmem:[#allocation9 + $0xe0] sm:$0xff] }
  0x7c   : > { %1365 = vmatprep.subr.mxu1 %v356_v24  ;;  %1331 = vmatpush3.msra.mxu0 %v375_v23  ;;  %v660_v62 = vld [vmem:[#allocation9 + $0x60] sm:$0xff]  ;;  %v678_v63 = vld [vmem:[#allocation9 + $0xd8] sm:$0xff]  ;;  %v677_v1 = vld [vmem:[#allocation9 + $0xd0] sm:$0xff] }
  0x7d   : > { %1366 = vmatpush3.msra.mxu1 %v356_v24  ;;  %1332 = vmatprep.subr.mxu0 %v374_v25  ;;  %v659_v0 = vld [vmem:[#allocation9 + $0x58] sm:$0xff]  ;;  %v658_v2 = vld [vmem:[#allocation9 + $0x50] sm:$0xff]  ;;  %v676_v3 = vld [vmem:[#allocation9 + $0xc8] sm:$0xff] }
  0x7e   : > { %1367 = vmatprep.subr.mxu1 %v355_v26  ;;  %1333 = vmatpush3.msra.mxu0 %v374_v25  ;;  %v657_v4 = vld [vmem:[#allocation9 + $0x48] sm:$0xff]  ;;  %v675_v5 = vld [vmem:[#allocation9 + $0xc0] sm:$0xff]  ;;  %v674_v7 = vld [vmem:[#allocation9 + $0xb8] sm:$0xff] }
  0x7f   : > { %1368 = vmatpush3.msra.mxu1 %v355_v26  ;;  %1334 = vmatprep.subr.mxu0 %v373_v27  ;;  %v656_v6 = vld [vmem:[#allocation9 + $0x40] sm:$0xff]  ;;  %v673_v8 = vld [vmem:[#allocation9 + $0xb0] sm:$0xff]  ;;  %v672_v9 = vld [vmem:[#allocation9 + $0xa8] sm:$0xff] }
  0x80   : > { %1369 = vmatprep.subr.mxu1 %v354_v28  ;;  %1335 = vmatpush3.msra.mxu0 %v373_v27  ;;  %v671_v10 = vld [vmem:[#allocation9 + $0xa0] sm:$0xff]  ;;  %v655_v11 = vld [vmem:[#allocation9 + $0x38] sm:$0xff]  ;;  %v654_v13 = vld [vmem:[#allocation9 + $0x30] sm:$0xff] }
  0x81   : > { %1370 = vmatpush3.msra.mxu1 %v354_v28  ;;  %1336 = vmatprep.subr.mxu0 %v372_v29  ;;  %v670_v12 = vld [vmem:[#allocation9 + $0x98] sm:$0xff]  ;;  %v669_v14 = vld [vmem:[#allocation9 + $0x90] sm:$0xff]  ;;  %v653_v17 = vld [vmem:[#allocation9 + $0x28] sm:$0xff] }
  0x82   : > { %1371 = vmatprep.subr.mxu1 %v353_v30  ;;  %1337 = vmatpush3.msra.mxu0 %v372_v29  ;;  %v668_v18 = vld [vmem:[#allocation9 + $0x88] sm:$0xff]  ;;  %v652_v19 = vld [vmem:[#allocation9 + $0x20] sm:$0xff]  ;;  %v651_v21 = vld [vmem:[#allocation9 + $0x18] sm:$0xff] }
  0x83   : > { %1372 = vmatpush3.msra.mxu1 %v353_v30  ;;  %1338 = vmatprep.subr.mxu0 %v371_v31  ;;  %v667_v20 = vld [vmem:[#allocation9 + $0x80] sm:$0xff]  ;;  %v851_v22 = vld [vmem:[#allocation9 + $0x178] sm:$0xff]  ;;  %v650_v23 = vld [vmem:[#allocation9 + $0x10] sm:$0xff] }
  0x84   : > { %1373 = vmatprep.subr.mxu1 %v352_v32  ;;  %1339 = vmatpush3.msra.mxu0 %v371_v31  ;;  %v649_v24 = vld [vmem:[#allocation9 + $0x8] sm:$0xff]  ;;  %v648_v25 = vld [vmem:[#allocation9] sm:$0xff]  ;;  %v954_v26 = vld [vmem:[#allocation10 + $0x78] sm:$0xff] }
  0x85   : > { %1374 = vmatpush3.msra.mxu1 %v352_v32  ;;  %1340 = vmatprep.subr.mxu0 %v370_v33  ;;  %v1174_v32 = vld [vmem:[%s2108_s2] ss:$0 sm:$0xff] }
  0x86   : > { %1375 = vmatprep.subr.mxu1 %v351_v34  ;;  %1341 = vmatpush3.msra.mxu0 %v370_v33 }
  0x87   : > { %1342 = vmatprep.mubr.f32.mxu0 %v2035_v15  ;;  %1376 = vmatpush3.msra.mxu1 %v351_v34 }
  0x88   : > { %1377 = vmatprep.mubr.f32.mxu1 %v349_v35  ;;  %1343 = vmatmul.mubr.f32.vlgmr.msra.gmra.mxu0 %v2039_v16 }
  0x89   : > { %1378 = vmatmul.mubr.f32.vlgmr.msra.gmra.mxu1 %v350_v36  ;;  %1380 = vmatprep.subr.mxu0 %v554_v37 }
  0x8a   : > { %1412 = vmatprep.mubr.f32.mxu0 %v536_v38  ;;  %1381 = vmatpush3.msra.mxu0 %v554_v37 }
  0x8b   : > { %1382 = vmatprep.subr.mxu0 %v553_v39  ;;  %1415 = vmatprep.subr.mxu1 %v682_v55 }
  0x8c   : > { %1383 = vmatpush3.msra.mxu0 %v553_v39  ;;  %1416 = vmatpush3.msra.mxu1 %v682_v55  ;;  %v950_v55 = vld [vmem:[#allocation10 + $0x58] sm:$0xff] }
  0x8d   : > { %1384 = vmatprep.subr.mxu0 %v552_v40  ;;  %1417 = vmatprep.subr.mxu1 %v681_v57 }
  0x8e   : > { %1385 = vmatpush3.msra.mxu0 %v552_v40  ;;  %1418 = vmatpush3.msra.mxu1 %v681_v57  ;;  %v949_v57 = vld [vmem:[#allocation10 + $0x50] sm:$0xff] }
  0x8f   : > { %1386 = vmatprep.subr.mxu0 %v551_v41  ;;  %1419 = vmatprep.subr.mxu1 %v680_v59 }
  0x90   : > { %1387 = vmatpush3.msra.mxu0 %v551_v41  ;;  %1420 = vmatpush3.msra.mxu1 %v680_v59  ;;  %v948_v59 = vld [vmem:[#allocation10 + $0x48] sm:$0xff] }
  0x91   : > { %1388 = vmatprep.subr.mxu0 %v550_v42  ;;  %1421 = vmatprep.subr.mxu1 %v679_v61 }
  0x92   : > { %1389 = vmatpush3.msra.mxu0 %v550_v42  ;;  %1422 = vmatpush3.msra.mxu1 %v679_v61  ;;  %v850_v42 = vld [vmem:[#allocation9 + $0x170] sm:$0xff]  ;;  %v947_v61 = vld [vmem:[#allocation10 + $0x40] sm:$0xff] }
  0x93   : > { %1390 = vmatprep.subr.mxu0 %v549_v43  ;;  %1423 = vmatprep.subr.mxu1 %v678_v63 }
  0x94   : > { %1391 = vmatpush3.msra.mxu0 %v549_v43  ;;  %1424 = vmatpush3.msra.mxu1 %v678_v63  ;;  %v849_v43 = vld [vmem:[#allocation9 + $0x168] sm:$0xff]  ;;  %v946_v63 = vld [vmem:[#allocation10 + $0x38] sm:$0xff] }
  0x95   : > { %1392 = vmatprep.subr.mxu0 %v548_v44  ;;  %1425 = vmatprep.subr.mxu1 %v677_v1 }
  0x96   : > { %1393 = vmatpush3.msra.mxu0 %v548_v44  ;;  %1426 = vmatpush3.msra.mxu1 %v677_v1  ;;  %v848_v44 = vld [vmem:[#allocation9 + $0x160] sm:$0xff]  ;;  %v945_v1 = vld [vmem:[#allocation10 + $0x30] sm:$0xff] }
  0x97   : > { %1394 = vmatprep.subr.mxu0 %v547_v45  ;;  %1427 = vmatprep.subr.mxu1 %v676_v3 }
  0x98   : > { %1395 = vmatpush3.msra.mxu0 %v547_v45  ;;  %1428 = vmatpush3.msra.mxu1 %v676_v3  ;;  %v847_v45 = vld [vmem:[#allocation9 + $0x158] sm:$0xff]  ;;  %v944_v3 = vld [vmem:[#allocation10 + $0x28] sm:$0xff] }
  0x99   : > { %1396 = vmatprep.subr.mxu0 %v546_v46  ;;  %1429 = vmatprep.subr.mxu1 %v675_v5 }
  0x9a   : > { %1397 = vmatpush3.msra.mxu0 %v546_v46  ;;  %1430 = vmatpush3.msra.mxu1 %v675_v5  ;;  %v943_v5 = vld [vmem:[#allocation10 + $0x20] sm:$0xff] }
  0x9b   : > { %1398 = vmatprep.subr.mxu0 %v545_v47  ;;  %1431 = vmatprep.subr.mxu1 %v674_v7 }
  0x9c   : > { %1399 = vmatpush3.msra.mxu0 %v545_v47  ;;  %1432 = vmatpush3.msra.mxu1 %v674_v7  ;;  %v942_v7 = vld [vmem:[#allocation10 + $0x18] sm:$0xff] }
  0x9d   : > { %1400 = vmatprep.subr.mxu0 %v544_v48  ;;  %1433 = vmatprep.subr.mxu1 %v673_v8 }
  0x9e   : > { %1401 = vmatpush3.msra.mxu0 %v544_v48  ;;  %1434 = vmatpush3.msra.mxu1 %v673_v8  ;;  %v941_v8 = vld [vmem:[#allocation10 + $0x10] sm:$0xff] }
  0x9f   : > { %1402 = vmatprep.subr.mxu0 %v543_v49  ;;  %1435 = vmatprep.subr.mxu1 %v672_v9 }
  0xa0   : > { %1403 = vmatpush3.msra.mxu0 %v543_v49  ;;  %1436 = vmatpush3.msra.mxu1 %v672_v9  ;;  %v953_v49 = vld [vmem:[#allocation10 + $0x70] sm:$0xff]  ;;  %v940_v9 = vld [vmem:[#allocation10 + $0x8] sm:$0xff] }
  0xa1   : > { %1404 = vmatprep.subr.mxu0 %v542_v50  ;;  %1437 = vmatprep.subr.mxu1 %v671_v10 }
  0xa2   : > { %1405 = vmatpush3.msra.mxu0 %v542_v50  ;;  %1438 = vmatpush3.msra.mxu1 %v671_v10  ;;  %v846_v50 = vld [vmem:[#allocation9 + $0x150] sm:$0xff] }
  0xa3   : > { %1406 = vmatprep.subr.mxu0 %v541_v51  ;;  %1439 = vmatprep.subr.mxu1 %v670_v12 }
  0xa4   : > { %1407 = vmatpush3.msra.mxu0 %v541_v51  ;;  %1440 = vmatpush3.msra.mxu1 %v670_v12  ;;  %v952_v51 = vld [vmem:[#allocation10 + $0x68] sm:$0xff] }
  0xa5   : > { %1408 = vmatprep.subr.mxu0 %v540_v52  ;;  %1441 = vmatprep.subr.mxu1 %v669_v14 }
  0xa6   : > { %1409 = vmatpush3.msra.mxu0 %v540_v52  ;;  %1442 = vmatpush3.msra.mxu1 %v669_v14  ;;  %v845_v52 = vld [vmem:[#allocation9 + $0x148] sm:$0xff] }
  0xa7   : > { %1410 = vmatprep.subr.mxu0 %v539_v53  ;;  %1443 = vmatprep.subr.mxu1 %v668_v18 }
  0xa8   : > { %1411 = vmatpush3.msra.mxu0 %v539_v53  ;;  %1444 = vmatpush3.msra.mxu1 %v668_v18  ;;  %v951_v53 = vld [vmem:[#allocation10 + $0x60] sm:$0xff] }
  0xa9   : > { %1413 = vmatmul.mubr.f32.vlgmr.msra.gmra.mxu0 %v537_v54  ;;  %1450 = vmatprep.subr.mxu0 %v663_v56  ;;  %v844_v54 = vld [vmem:[#allocation9 + $0x140] sm:$0xff] }
  0xaa   : > { %1451 = vmatpush3.msra.mxu0 %v663_v56  ;;  %1445 = vmatprep.subr.mxu1 %v667_v20  ;;  %v843_v56 = vld [vmem:[#allocation9 + $0x138] sm:$0xff] }
  0xab   : > { %1452 = vmatprep.subr.mxu0 %v662_v58  ;;  %1446 = vmatpush3.msra.mxu1 %v667_v20 }
  0xac   : > { %1453 = vmatpush3.msra.mxu0 %v662_v58  ;;  %1485 = vmatprep.subr.mxu1 %v851_v22  ;;  %v842_v58 = vld [vmem:[#allocation9 + $0x130] sm:$0xff] }
  0xad   : > { %1454 = vmatprep.subr.mxu0 %v661_v60 }
  0xae   : > { %1455 = vmatpush3.msra.mxu0 %v661_v60  ;;  %v841_v60 = vld [vmem:[#allocation9 + $0x128] sm:$0xff] }
  0xaf   : > { %1456 = vmatprep.subr.mxu0 %v660_v62 }
  0xb0   : > { %1457 = vmatpush3.msra.mxu0 %v660_v62  ;;  %v840_v62 = vld [vmem:[#allocation9 + $0x120] sm:$0xff] }
  0xb1   : > { %1458 = vmatprep.subr.mxu0 %v659_v0 }
  0xb2   : > { %1459 = vmatpush3.msra.mxu0 %v659_v0  ;;  %v839_v0 = vld [vmem:[#allocation9 + $0x118] sm:$0xff] }
  0xb3   : > { %1460 = vmatprep.subr.mxu0 %v658_v2 }
  0xb4   : > { %1461 = vmatpush3.msra.mxu0 %v658_v2  ;;  %v838_v2 = vld [vmem:[#allocation9 + $0x110] sm:$0xff] }
  0xb5   : > { %1462 = vmatprep.subr.mxu0 %v657_v4 }
  0xb6   : > { %1463 = vmatpush3.msra.mxu0 %v657_v4  ;;  %v837_v4 = vld [vmem:[#allocation9 + $0x108] sm:$0xff] }
  0xb7   : > { %1464 = vmatprep.subr.mxu0 %v656_v6 }
  0xb8   : > { %1465 = vmatpush3.msra.mxu0 %v656_v6  ;;  %v836_v6 = vld [vmem:[#allocation9 + $0x100] sm:$0xff] }
  0xb9   : > { %1466 = vmatprep.subr.mxu0 %v655_v11 }
  0xba   : > { %1467 = vmatpush3.msra.mxu0 %v655_v11  ;;  %v939_v11 = vld [vmem:[#allocation10] sm:$0xff] }
  0xbb   : > { %1468 = vmatprep.subr.mxu0 %v654_v13 }
  0xbc   : > { %1469 = vmatpush3.msra.mxu0 %v654_v13 }
  0xbd   : > { %1470 = vmatprep.subr.mxu0 %v653_v17 }
  0xbe   : > { %1471 = vmatpush3.msra.mxu0 %v653_v17 }
  0xbf   : > { %1472 = vmatprep.subr.mxu0 %v652_v19 }
  0xc0   : > { %1473 = vmatpush3.msra.mxu0 %v652_v19 }
  0xc1   : > { %1474 = vmatprep.subr.mxu0 %v651_v21 }
  0xc2   : > { %1475 = vmatpush3.msra.mxu0 %v651_v21 }
  0xc3   : > { %1476 = vmatprep.subr.mxu0 %v650_v23 }
  0xc4   : > { %1477 = vmatpush3.msra.mxu0 %v650_v23  ;;  %v1176_v23 = vld [vmem:[%s2112_s6] ss:$0 sm:$0xff] }
  0xc5   : > { %1478 = vmatprep.subr.mxu0 %v649_v24 }
  0xc6   : > { %1479 = vmatpush3.msra.mxu0 %v649_v24 }
  0xc7   : > { %1480 = vmatprep.subr.mxu0 %v648_v25 }
  0xc8   : > { %1481 = vmatpush3.msra.mxu0 %v648_v25 }
  0xc9   : > { %1520 = vmatprep.subr.mxu0 %v954_v26 }
 0x148   : > { %v1344_v27 = vpop.f32.mrf.mxu0 }
 0x149   : > { %v1379_v28 = vpop.f32.mrf.mxu1 }
 0x14a   : > { %v452_v29 = vpop.f32.mrf.mxu0  ;;  %v533_v31 = vadd.f32 %v1379_v28, %v1344_v27 }
 0x14b   : > { %v527_v30 = vpop.f32.mrf.mxu1 }
 0x14c   : > { %v528_v34 = vadd.f32 %v527_v30, %v452_v29 }
 0x169   : > { %v1414_v33 = vpop.f32.mrf.mxu0 }
 0x16a   : > { %v631_v35 = vadd.f32 %v1414_v33, %v533_v31 }
 0x16b   : > { %v621_v36 = vpop.f32.mrf.mxu0 }
 0x16c   : > { %v639_v37 = vadd.f32 %v1174_v32, %v631_v35  ;;  %v630_v38 = vadd.f32 %v621_v36, %v528_v34 }
 0x16e   : > { %v641_v39 = vmax.f32 %v639_v37, 0.0  ;;  %v638_v40 = vadd.f32 %v1174_v32, %v630_v38 }
 0x170   : > { %643 = vst [vmem:[#allocation3 + $0x9] sm:$0xff] %v641_v39  ;;  %v640_v41 = vmax.f32 %v638_v40, 0.0 }
 0x172   : > { %642 = vst [vmem:[#allocation3 + $0x1] sm:$0xff] %v640_v41  ;;  %1447 = vmatprep.mubr.f32.mxu1 %v640_v41 }
 0x173   : > { %1448 = vmatmul.mubr.f32.vlgmr.msra.gmra.mxu1 %v641_v39 }
 0x174   : > { %1486 = vmatpush3.msra.mxu1 %v851_v22  ;;  %v1175_v22 = vld [vmem:[%s2110_s4] ss:$0 sm:$0xff] }
 0x175   : > { %1487 = vmatprep.subr.mxu1 %v850_v42 }
 0x176   : > { %1488 = vmatpush3.msra.mxu1 %v850_v42 }
 0x177   : > { %1489 = vmatprep.subr.mxu1 %v849_v43  ;;  %v834_v10 = vld [vmem:[#allocation3 + $0xa] sm:$0xff] }
 0x178   : > { %1490 = vmatpush3.msra.mxu1 %v849_v43 }
 0x179   : > { %v646_v46 = vld [vmem:[#allocation3] sm:$0xff]  ;;  %v647_v47 = vld [vmem:[#allocation3 + $0x8] sm:$0xff]  ;;  %1491 = vmatprep.subr.mxu1 %v848_v44 }
 0x17a   : > { %v833_v48 = vld [vmem:[#allocation3 + $0x2] sm:$0xff]  ;;  %1482 = vmatprep.mubr.f32.mxu0 %v646_v46  ;;  %1492 = vmatpush3.msra.mxu1 %v848_v44 }
 0x17b   : > { %1517 = vmatprep.mubr.f32.mxu1 %v833_v48  ;;  %1483 = vmatmul.mubr.f32.vlgmr.msra.gmra.mxu0 %v647_v47 }
 0x17c   : > { %1521 = vmatpush3.msra.mxu0 %v954_v26  ;;  %1493 = vmatprep.subr.mxu1 %v847_v45 }
 0x17d   : > { %1522 = vmatprep.subr.mxu0 %v953_v49  ;;  %1494 = vmatpush3.msra.mxu1 %v847_v45 }
 0x17e   : > { %1523 = vmatpush3.msra.mxu0 %v953_v49  ;;  %1495 = vmatprep.subr.mxu1 %v846_v50 }
 0x17f   : > { %1524 = vmatprep.subr.mxu0 %v952_v51  ;;  %1496 = vmatpush3.msra.mxu1 %v846_v50 }
 0x180   : > { %1525 = vmatpush3.msra.mxu0 %v952_v51  ;;  %1497 = vmatprep.subr.mxu1 %v845_v52 }
 0x181   : > { %1526 = vmatprep.subr.mxu0 %v951_v53  ;;  %1498 = vmatpush3.msra.mxu1 %v845_v52 }
 0x182   : > { %1527 = vmatpush3.msra.mxu0 %v951_v53  ;;  %1499 = vmatprep.subr.mxu1 %v844_v54 }
 0x183   : > { %1528 = vmatprep.subr.mxu0 %v950_v55  ;;  %1500 = vmatpush3.msra.mxu1 %v844_v54 }
 0x184   : > { %1529 = vmatpush3.msra.mxu0 %v950_v55  ;;  %1501 = vmatprep.subr.mxu1 %v843_v56 }
 0x185   : > { %1530 = vmatprep.subr.mxu0 %v949_v57  ;;  %1502 = vmatpush3.msra.mxu1 %v843_v56 }
 0x186   : > { %1531 = vmatpush3.msra.mxu0 %v949_v57  ;;  %1503 = vmatprep.subr.mxu1 %v842_v58 }
 0x187   : > { %1532 = vmatprep.subr.mxu0 %v948_v59  ;;  %1504 = vmatpush3.msra.mxu1 %v842_v58 }
 0x188   : > { %1533 = vmatpush3.msra.mxu0 %v948_v59  ;;  %1505 = vmatprep.subr.mxu1 %v841_v60 }
 0x189   : > { %1534 = vmatprep.subr.mxu0 %v947_v61  ;;  %1506 = vmatpush3.msra.mxu1 %v841_v60 }
 0x18a   : > { %1535 = vmatpush3.msra.mxu0 %v947_v61  ;;  %1507 = vmatprep.subr.mxu1 %v840_v62 }
 0x18b   : > { %1536 = vmatprep.subr.mxu0 %v946_v63  ;;  %1508 = vmatpush3.msra.mxu1 %v840_v62 }
 0x18c   : > { %1537 = vmatpush3.msra.mxu0 %v946_v63  ;;  %1509 = vmatprep.subr.mxu1 %v839_v0 }
 0x18d   : > { %1538 = vmatprep.subr.mxu0 %v945_v1  ;;  %1510 = vmatpush3.msra.mxu1 %v839_v0 }
 0x18e   : > { %1539 = vmatpush3.msra.mxu0 %v945_v1  ;;  %1511 = vmatprep.subr.mxu1 %v838_v2 }
 0x18f   : > { %1540 = vmatprep.subr.mxu0 %v944_v3  ;;  %1512 = vmatpush3.msra.mxu1 %v838_v2 }
 0x190   : > { %1541 = vmatpush3.msra.mxu0 %v944_v3  ;;  %1513 = vmatprep.subr.mxu1 %v837_v4 }
 0x191   : > { %1542 = vmatprep.subr.mxu0 %v943_v5  ;;  %1514 = vmatpush3.msra.mxu1 %v837_v4 }
 0x192   : > { %1543 = vmatpush3.msra.mxu0 %v943_v5  ;;  %1515 = vmatprep.subr.mxu1 %v836_v6 }
 0x193   : > { %1544 = vmatprep.subr.mxu0 %v942_v7  ;;  %1516 = vmatpush3.msra.mxu1 %v836_v6 }
 0x194   : > { %1545 = vmatpush3.msra.mxu0 %v942_v7  ;;  %1552 = vmatprep.mubr.f32.mxu0 %v2035_v15 }
 0x195   : > { %1546 = vmatprep.subr.mxu0 %v941_v8  ;;  %1518 = vmatmul.mubr.f32.vlgmr.msra.gmra.mxu1 %v834_v10 }
 0x196   : > { %1547 = vmatpush3.msra.mxu0 %v941_v8 }
 0x197   : > { %1548 = vmatprep.subr.mxu0 %v940_v9 }
 0x198   : > { %1549 = vmatpush3.msra.mxu0 %v940_v9 }
 0x199   : > { %1550 = vmatprep.subr.mxu0 %v939_v11 }
 0x19a   : > { %1551 = vmatpush3.msra.mxu0 %v939_v11 }
 0x19b   : > { %1553 = vmatmul.mubr.f32.vlgmr.msra.gmra.mxu0 %v2039_v16 }
 0x233   : > { %v1449_v12 = vpop.f32.mrf.mxu1 }
 0x235   : > { %v749_v14 = vpop.f32.mrf.mxu1 }
 0x23b   : > { %v1484_v13 = vpop.f32.mrf.mxu0 }
 0x23c   : > { %v830_v19 = vadd.f32 %v1484_v13, %v1449_v12 }
 0x23d   : > { %v824_v17 = vpop.f32.mrf.mxu0 }
 0x23e   : > { %v825_v20 = vadd.f32 %v824_v17, %v749_v14 }
 0x255   : > { %v1519_v18 = vpop.f32.mrf.mxu1 }
 0x256   : > { %v928_v21 = vadd.f32 %v1519_v18, %v830_v19 }
 0x257   : > { %v918_v15 = vpop.f32.mrf.mxu1 }
 0x258   : > { %v927_v16 = vadd.f32 %v918_v15, %v825_v20  ;;  %v936_v25 = vadd.f32 %v1175_v22, %v928_v21 }
 0x25a   : > { %v935_v29 = vadd.f32 %v1175_v22, %v927_v16 }
 0x25b   : > { %v1554_v24 = vpop.f32.mrf.mxu0 }
 0x25c   : > { %v1034_v26 = vadd.f32 %v1554_v24, %v1176_v23 }
 0x25d   : > { %v1028_v27 = vpop.f32.mrf.mxu0 }
 0x25e   : > { %v1038_v28 = vadd.f32 %v1034_v26, %v936_v25  ;;  %v1029_v30 = vadd.f32 %v1176_v23, %v1028_v27 }
 0x260   : > { %v1040_v31 = vmax.f32 %v1038_v28, 0.0  ;;  %v1037_v32 = vadd.f32 %v1029_v30, %v935_v29 }
 0x262   : > { %1042 = vst [vmem:[%s340_s11 + $0x8] sm:$0xff] %v1040_v31  ;;  %v1039_v33 = vmax.f32 %v1037_v32, 0.0 }
 0x264   : > { %1041 = vst [vmem:[%s340_s11] sm:$0xff] %v1039_v33 }
 0x265   : > { %1756 = shalt.err (!%p1753_p10)
}
 0x266   : > { %s1757_s10 = scalar_lea.hbm %s2063_s16, 256  ;;  %s1761_s29 = scalar_lea.hbm %s2113_s7, 512 }
 0x267   : > { %p1758_p6 = scmp.ne.s32.totalorder %s2063_s16, %s1757_s10  ;;  %p1762_p3 = scmp.lt.s32.totalorder %s2063_s16, %s2113_s7 }
 0x268   : > { %p1763_p11 = scmp.lt.s32.totalorder %s1761_s29, %s1757_s10 }
 0x269   : > { %p1759_p4 = pnand %p1758_p6, %p2136_p1 }
 0x26a   : > { %p1764_p5 = por %p1763_p11, %p1762_p3 }
 0x26b   : > { %p1760_p8 = pneg %p1759_p4 }
 0x26d   : > { %p1765_p7 = pnand %p1764_p5, %p1760_p8 }
 0x26f   : > { %1768 = shalt.err (!%p1765_p7)
}
 0x270   : > { %s1825_s18 = smov 128   ;;  %s1826_s23 = smov 8  }
 0x271   : > { %1569 = dma.vmem_to_hbm [thread:$0]  (%p2136_p1), %s2058_s21, 256, %s2063_s16, %s1044_s1, %s1825_s18, %s1825_s18, %s1826_s23  }
 0x272 PF: > { %s1072_s12 = sand.u32 1, %s1803_s24   ;;  %p2137_p12 = scmp.ne.s32.totalorder %s2122_s8, 0 }
 0x273   : > { %p2138_p9 = scmp.ge.s32.totalorder %s1815_s27, 2  ;;  %s1073_s28 = scalar_lea.sflag [#allocation6], %s1072_s12 }
 0x275   : > { %p1586_p13 = pnand %p2138_p9, %p2137_p12 }
 0x277   : > { %p1587_p0 = pneg %p1586_p13 }
 0x279   : > { %1798 = dma.done.wait (%p1587_p0), %s1073_s28, 256  }
 0x27a   : > { %1800 = vsyncadd (%p1587_p0), %s1073_s28, 4294967040  ;;  %p22_p2 = scmp.ge.s32.totalorder %s1956_s14, 4   ;;  %s2139_s24 = smov %s1807_s25 }
 0x27b   : > { %s2140_s25 = smov %s1811_s26  ;;  %s2141_s26 = smov %s1966_s17 }
 0x27c   : > { %s2142_s27 = smov %s1956_s14  ;;  %24 = sbr.rel (!%p22_p2) target bundleno = 9 (0x9), region = 109 }
 0x281   :  { %1078 = vsyncpa [#allocation5], 1 }
 0x282   :  { %1080 = vsyncpa [#allocation5 + $0x1], 1 }
 0x283   :  { %1081 = vsyncpa [#allocation8], 1 }
 0x284   :  { %1082 = vsyncpa [#allocation11], 1 }
 0x285   :  { %1083 = vsyncpa [#allocation6], 1 }
 0x286   :  { %1085 = vsyncpa [#allocation6 + $0x1], 1 }

</bundles_post_ra>
